<compile_context>
chip_gen: v5e
topology: v5e:2x2
jax: 0.10.0
libtpu: 0.0.40
codegen_flags: <defaults>
</compile_context>

<pallas_src>
import functools

import jax
import jax.numpy as jnp
import numpy as np
from jax.experimental import pallas as pl
from jax.experimental.pallas import tpu as pltpu


# ------------------------------- helpers -------------------------------------

def _softmax_last(x):
    x = x - jnp.max(x, axis=-1, keepdims=True)
    e = jnp.exp(x)
    return e / jnp.sum(e, axis=-1, keepdims=True)


def _round_up(x, m):
    return ((x + m - 1) // m) * m


def _cdiv(a, b):
    return -(-a // b)


def _pick_block_b(batch, bytes_per_row, *, min_sublane=8,
                  vmem_budget=10 * 1024 * 1024, max_block=4096):
    """Largest batch tile (multiple of min_sublane) whose double-buffered
    input+output stream fits in a conservative VMEM budget; guarantees >=2
    grid steps when the batch is big enough to split (v7x dual-TC)."""
    cap = vmem_budget // (2 * bytes_per_row)                  # 2x double buffering
    cap = max(min_sublane, (cap // min_sublane) * min_sublane)
    block_b = min(cap, max_block, _round_up(batch, min_sublane))
    block_b = max(min_sublane, (block_b // min_sublane) * min_sublane)
    if block_b >= batch and batch > min_sublane:
        # Split into (at least) 2 steps so the "parallel" grid axis can be
        # sharded across the two v7x TensorCores.
        block_b = _round_up(_cdiv(batch, 2), min_sublane)
    return block_b


def _vmem_limit(stream_tile_bytes, weight_bytes, headroom=8 * 1024 * 1024,
                floor=16 * 1024 * 1024):
    """Scoped VMEM limit: double-buffered stream + double-buffered weights + headroom."""
    needed = 2 * stream_tile_bytes + 2 * weight_bytes + headroom
    return int(min(max(needed, floor), 120 * 1024 * 1024))


# ----------------------------- type == 'single' -------------------------------

def _single_gate_kernel(*refs, num_expert):
    emb_refs = refs[:num_expert]
    w_ref = refs[num_expert]          # (num_expert, D, E) resident across grid
    o_ref = refs[num_expert + 1]      # (TB, E) f32

    # logits = concat(embs) @ W.T  ==  sum_e emb_e @ W_chunk_e   (no transpose)
    logits = jnp.dot(emb_refs[0][...], w_ref[0],
                     preferred_element_type=jnp.float32)
    for e in range(1, num_expert):
        logits = logits + jnp.dot(emb_refs[e][...], w_ref[e],
                                  preferred_element_type=jnp.float32)
    o_ref[...] = _softmax_last(logits).astype(o_ref.dtype)


def gate_single(embs, w, *, block_b=None, compute_dtype=None,
                vmem_limit_bytes=None):
    """embs: list of (B, D) arrays; w: (E, num_expert * D) [PyTorch Linear layout]."""
    num_expert = len(embs)
    E = w.shape[0]
    B, D = embs[0].shape
    assert w.shape[1] == num_expert * D

    if compute_dtype is not None:
        embs = [e.astype(compute_dtype) for e in embs]
        w = w.astype(compute_dtype)

    itemsize = jnp.dtype(embs[0].dtype).itemsize
    min_sublane = 16 if itemsize == 2 else 8
    # Real VMEM footprint per batch row: lane dim padded to 128; f32 output row.
    bytes_per_row = num_expert * _round_up(D, 128) * itemsize + _round_up(E, 128) * 4
    if block_b is None:
        block_b = _pick_block_b(B, bytes_per_row, min_sublane=min_sublane)
    grid_b = _cdiv(B, block_b)

    # (E, num_expert*D) -> per-emb chunks stacked as (num_expert, D, E): x @ chunk.
    w_stacked = jnp.transpose(w.reshape(E, num_expert, D), (1, 2, 0))

    if vmem_limit_bytes is None:
        w_vmem = num_expert * _round_up(D, 8) * _round_up(E, 128) * itemsize
        vmem_limit_bytes = _vmem_limit(block_b * bytes_per_row, w_vmem)

    in_specs = ([pl.BlockSpec((block_b, D), lambda i: (i, 0))
                 for _ in range(num_expert)]
                + [pl.BlockSpec((num_expert, D, E), lambda i: (0, 0, 0))])

    return pl.pallas_call(
        functools.partial(_single_gate_kernel, num_expert=num_expert),
        out_shape=jax.ShapeDtypeStruct((B, E), jnp.float32),
        grid_spec=pltpu.PrefetchScalarGridSpec(
            num_scalar_prefetch=0,
            grid=(grid_b,),
            in_specs=in_specs,
            out_specs=pl.BlockSpec((block_b, E), lambda i: (i, 0)),
        ),
        compiler_params=pltpu.CompilerParams(
            dimension_semantics=("parallel",),
            vmem_limit_bytes=vmem_limit_bytes),
    )(*embs, w_stacked)


# ----------------------------- type == 'multi' --------------------------------

def _build_lower_blockdiag(w_lower, d):
    """w_lower: (num_gate, n_eg, n_eg*d)  ->  (num_expert, d, num_expert)
    per-embedding chunks of the block-diagonal lower-gate weight (vectorized)."""
    num_gate, n_eg, _ = w_lower.shape
    num_expert = num_gate * n_eg
    w4 = w_lower.reshape(num_gate, n_eg, n_eg, d)        # [g, out_j, in_el, k]
    eye_g = jnp.eye(num_gate, dtype=w_lower.dtype)
    # out[g, el, k, h, j] = w4[g, j, el, k] * eye[g, h]
    blk = jnp.einsum('gjek,gh->gekhj', w4, eye_g)
    return blk.reshape(num_expert, d, num_expert)


def _multi_gate_kernel(*refs, num_gate, n_eg):
    num_expert = num_gate * n_eg
    emb_refs = refs[:num_expert]
    wl_ref = refs[num_expert]          # (num_expert, D, num_expert) block-diag chunks
    wt_ref = refs[num_expert + 1]      # (num_gate, D, num_gate)
    gv_ref = refs[num_expert + 2]      # (TB, num_expert) f32

    xs = [r[...] for r in emb_refs]

    # Fused block-diagonal lower matmul -> (TB, num_expert) logits in one MXU stream.
    lower = jnp.dot(xs[0], wl_ref[0], preferred_element_type=jnp.float32)
    for e in range(1, num_expert):
        lower = lower + jnp.dot(xs[e], wl_ref[e],
                                preferred_element_type=jnp.float32)

    # Segmented (per-gate) softmax directly on the full lane layout (no lane slices).
    lane_gate = jax.lax.broadcasted_iota(jnp.int32, (1, num_expert), 1) // n_eg
    m_b = jnp.zeros_like(lower)
    for g in range(num_gate):
        in_g = lane_gate == g
        m_g = jnp.max(jnp.where(in_g, lower, -jnp.inf), axis=-1, keepdims=True)
        m_b = jnp.where(in_g, m_g, m_b)
    exp_s = jnp.exp(lower - m_b)
    same_gate = (
        jax.lax.broadcasted_iota(jnp.int32, (num_expert, num_expert), 0) // n_eg
        == jax.lax.broadcasted_iota(jnp.int32, (num_expert, num_expert), 1) // n_eg
    ).astype(jnp.float32)
    denom = jnp.dot(exp_s, same_gate, preferred_element_type=jnp.float32)
    p = exp_s / denom                                   # (TB, num_expert)

    # Expert-weighted mix per gate + fused top matmul -> (TB, num_gate) logits.
    top = None
    for g in range(num_gate):
        e0 = g * n_eg
        gi = xs[e0].astype(jnp.float32) * p[:, e0:e0 + 1]
        for el in range(1, n_eg):
            e = e0 + el
            gi = gi + xs[e].astype(jnp.float32) * p[:, e:e + 1]
        t = jnp.dot(gi, wt_ref[g].astype(jnp.float32),
                    preferred_element_type=jnp.float32)
        top = t if top is None else top + t
    h_top = _softmax_last(top)                          # (TB, num_gate)

    # gate_values = p * (h_top expanded to expert lanes via tiny constant matmul).
    indicator = (
        jax.lax.broadcasted_iota(jnp.int32, (num_gate, num_expert), 0)
        == jax.lax.broadcasted_iota(jnp.int32, (num_gate, num_expert), 1) // n_eg
    ).astype(jnp.float32)
    gv = p * jnp.dot(h_top, indicator, preferred_element_type=jnp.float32)
    gv_ref[...] = gv.astype(gv_ref.dtype)


def gate_multi(embs, w_lower, w_top, *, block_b=None, compute_dtype=None,
               vmem_limit_bytes=None):
    """embs: list of (B, D); w_lower: (num_gate, n_eg, n_eg*D); w_top: (num_gate, num_gate*D)."""
    num_gate, n_eg, lower_dim = w_lower.shape
    d = lower_dim // n_eg
    num_expert = num_gate * n_eg
    assert len(embs) == num_expert
    B, D = embs[0].shape
    assert D == d and w_top.shape == (num_gate, num_gate * d)

    if compute_dtype is not None:
        embs = [e.astype(compute_dtype) for e in embs]
        w_lower = w_lower.astype(compute_dtype)
        w_top = w_top.astype(compute_dtype)

    itemsize = jnp.dtype(embs[0].dtype).itemsize
    min_sublane = 16 if itemsize == 2 else 8
    bytes_per_row = (num_expert * _round_up(d, 128) * itemsize
                     + _round_up(num_expert, 128) * 4)
    if block_b is None:
        block_b = _pick_block_b(B, bytes_per_row, min_sublane=min_sublane)
    grid_b = _cdiv(B, block_b)

    wl_stacked = _build_lower_blockdiag(w_lower, d)             # (num_expert, d, num_expert)
    wt_stacked = jnp.transpose(w_top.reshape(num_gate, num_gate, d),
                               (1, 2, 0))                       # (num_gate, d, num_gate)

    if vmem_limit_bytes is None:
        w_vmem = (num_expert * _round_up(d, 8) * _round_up(num_expert, 128)
                  + num_gate * _round_up(d, 8) * _round_up(num_gate, 128)) * itemsize
        vmem_limit_bytes = _vmem_limit(block_b * bytes_per_row, w_vmem)

    in_specs = ([pl.BlockSpec((block_b, d), lambda i: (i, 0))
                 for _ in range(num_expert)]
                + [pl.BlockSpec((num_expert, d, num_expert), lambda i: (0, 0, 0)),
                   pl.BlockSpec((num_gate, d, num_gate), lambda i: (0, 0, 0))])

    return pl.pallas_call(
        functools.partial(_multi_gate_kernel, num_gate=num_gate, n_eg=n_eg),
        out_shape=jax.ShapeDtypeStruct((B, num_expert), jnp.float32),
        grid_spec=pltpu.PrefetchScalarGridSpec(
            num_scalar_prefetch=0,
            grid=(grid_b,),
            in_specs=in_specs,
            out_specs=pl.BlockSpec((block_b, num_expert), lambda i: (i, 0)),
        ),
        compiler_params=pltpu.CompilerParams(
            dimension_semantics=("parallel",),
            vmem_limit_bytes=vmem_limit_bytes),
    )(*embs, wl_stacked, wt_stacked)


# ----------------------------- pure-JAX references ----------------------------

def ref_single(embs, w):
    x = jnp.concatenate(embs, axis=1)
    return jax.nn.softmax(x @ w.T, axis=1)


def ref_multi(embs, w_lower, w_top):
    x = jnp.concatenate(embs, axis=1)
    num_gate, n_eg, lower_dim = w_lower.shape
    d = lower_dim // n_eg
    h_gates = jnp.stack(
        [x[:, g * lower_dim:(g + 1) * lower_dim] @ w_lower[g].T
         for g in range(num_gate)], axis=1)                       # (B, num_gate, n_eg)
    h_gates = jax.nn.softmax(h_gates, axis=2)
    gate_input = jnp.einsum(
        'bned,bne->bnd', x.reshape(-1, num_gate, n_eg, d), h_gates
    ).reshape(-1, num_gate * d)
    h_top = jax.nn.softmax(gate_input @ w_top.T, axis=1)          # (B, num_gate)
    return jnp.einsum('bne,bn->bne', h_gates, h_top).reshape(-1, num_gate * n_eg)


# ----------------------------------- main --------------------------------------

if __name__ == "__main__":
    key = jax.random.PRNGKey(0)
    D = 32

    # ---- single gate: num_expert = 2 ----
    E = 2
    B = 8
    k0, k1, k2 = jax.random.split(key, 3)
    embs_s = [jax.random.normal(jax.random.fold_in(k0, i), (B, D), jnp.float32)
              for i in range(E)]
    w_single = 0.1 * jax.random.normal(k1, (E, E * D), jnp.float32)

    out_s = jax.block_until_ready(gate_single(embs_s, w_single))
    ref_s = ref_single(embs_s, w_single)
    np.testing.assert_allclose(np.asarray(out_s), np.asarray(ref_s),
                               rtol=1e-4, atol=1e-5)

    # bf16 input path (halves HBM read bytes; output stays f32)
    out_s_bf16 = jax.block_until_ready(
        gate_single(embs_s, w_single, compute_dtype=jnp.bfloat16))
    np.testing.assert_allclose(np.asarray(out_s_bf16), np.asarray(ref_s),
                               rtol=3e-2, atol=3e-2)

    # ---- multi gate: num_expert = 4, num_gate = 2 ----
    num_expert, num_gate = 4, 2
    n_eg = num_expert // num_gate
    embs_m = [jax.random.normal(jax.random.fold_in(k2, i), (B, D), jnp.float32)
              for i in range(num_expert)]
    kw1, kw2 = jax.random.split(jax.random.fold_in(key, 7))
    w_lower = 0.1 * jax.random.normal(kw1, (num_gate, n_eg, n_eg * D), jnp.float32)
    w_top = 0.1 * jax.random.normal(kw2, (num_gate, num_gate * D), jnp.float32)

    out_m = jax.block_until_ready(gate_multi(embs_m, w_lower, w_top))
    ref_m = ref_multi(embs_m, w_lower, w_top)
    np.testing.assert_allclose(np.asarray(out_m), np.asarray(ref_m),
                               rtol=1e-4, atol=1e-5)

    # ---- larger, ragged batch: exercises masked last block + >=2 grid steps ----
    B2 = 300
    embs_m2 = [jax.random.normal(jax.random.fold_in(key, 100 + i), (B2, D), jnp.float32)
               for i in range(num_expert)]
    out_m2 = jax.block_until_ready(gate_multi(embs_m2, w_lower, w_top))
    ref_m2 = ref_multi(embs_m2, w_lower, w_top)
    np.testing.assert_allclose(np.asarray(out_m2), np.asarray(ref_m2),
                               rtol=1e-4, atol=1e-5)

    # bf16 multi path on the ragged batch (16-row sublane tiling path)
    out_m2_bf16 = jax.block_until_ready(
        gate_multi(embs_m2, w_lower, w_top, compute_dtype=jnp.bfloat16))
    np.testing.assert_allclose(np.asarray(out_m2_bf16), np.asarray(ref_m2),
                               rtol=5e-2, atol=3e-2)

    print("KERNEL_OK")
</pallas_src>

<mosaic_0001>
module attributes {stable_mosaic.version = 11 : i64} {
  func.func @_single_gate_kernel(%arg0: i32, %arg1: memref<8x32xf32, #tpu.memory_space<vmem>>, %arg2: memref<8x32xf32, #tpu.memory_space<vmem>>, %arg3: memref<2x32x2xf32, #tpu.memory_space<vmem>>, %arg4: memref<8x2xf32, #tpu.memory_space<vmem>>) attributes {dimension_semantics = [#tpu.dimension_semantics<parallel>], iteration_bounds = array<i64: 1>, scalar_prefetch = 0 : i64, scratch_operands = 0 : i64, tpu.core_type = #tpu.core_type<tc>, window_params = [{transform_indices = @transform_0, window_bounds = array<i64: 8, 32>}, {transform_indices = @transform_1, window_bounds = array<i64: 8, 32>}, {pipeline_mode = #tpu.pipeline_mode<synchronous>, transform_indices = @transform_2, window_bounds = array<i64: 2, 32, 2>}, {transform_indices = @transform_3, window_bounds = array<i64: 8, 2>}]} {
    %c0 = arith.constant 0 : index
    %c0_0 = arith.constant 0 : index
    %0 = vector.load %arg1[%c0, %c0_0] : memref<8x32xf32, #tpu.memory_space<vmem>>, vector<8x32xf32>
    %c0_1 = arith.constant 0 : index
    %c0_2 = arith.constant 0 : index
    %c0_3 = arith.constant 0 : index
    %1 = vector.load %arg3[%c0_1, %c0_2, %c0_3] : memref<2x32x2xf32, #tpu.memory_space<vmem>>, vector<1x32x2xf32>
    %2 = vector.shape_cast %1 : vector<1x32x2xf32> to vector<32x2xf32>
    %cst = arith.constant dense<0.000000e+00> : vector<8x2xf32>
    %3 = tpu.matmul %0, %2, %cst {dimension_numbers = #tpu.dot_dimension_numbers<[1], [0], [0], [1], [0, 0, 1, 1], [], []>} : vector<8x32xf32>, vector<32x2xf32>, vector<8x2xf32> -> vector<8x2xf32>
    %c0_4 = arith.constant 0 : index
    %c0_5 = arith.constant 0 : index
    %4 = vector.load %arg2[%c0_4, %c0_5] : memref<8x32xf32, #tpu.memory_space<vmem>>, vector<8x32xf32>
    %c1 = arith.constant 1 : index
    %c0_6 = arith.constant 0 : index
    %c0_7 = arith.constant 0 : index
    %5 = vector.load %arg3[%c1, %c0_6, %c0_7] : memref<2x32x2xf32, #tpu.memory_space<vmem>>, vector<1x32x2xf32>
    %6 = vector.shape_cast %5 : vector<1x32x2xf32> to vector<32x2xf32>
    %cst_8 = arith.constant dense<0.000000e+00> : vector<8x2xf32>
    %7 = tpu.matmul %4, %6, %cst_8 {dimension_numbers = #tpu.dot_dimension_numbers<[1], [0], [0], [1], [0, 0, 1, 1], [], []>} : vector<8x32xf32>, vector<32x2xf32>, vector<8x2xf32> -> vector<8x2xf32>
    %8 = arith.addf %3, %7 : vector<8x2xf32>
    %cst_9 = arith.constant dense<0xFF800000> : vector<8xf32>
    %9 = vector.multi_reduction <maximumf>, %8, %cst_9 [1] : vector<8x2xf32> to vector<8xf32>
    %10 = vector.shape_cast %9 : vector<8xf32> to vector<8x1xf32>
    %11 = vector.broadcast %10 : vector<8x1xf32> to vector<8x2xf32>
    %12 = arith.subf %8, %11 : vector<8x2xf32>
    %13 = math.exp %12 : vector<8x2xf32>
    %cst_10 = arith.constant dense<0.000000e+00> : vector<8xf32>
    %14 = vector.multi_reduction <add>, %13, %cst_10 [1] : vector<8x2xf32> to vector<8xf32>
    %15 = vector.shape_cast %14 : vector<8xf32> to vector<8x1xf32>
    %16 = vector.broadcast %15 : vector<8x1xf32> to vector<8x2xf32>
    %17 = arith.divf %13, %16 : vector<8x2xf32>
    %c0_11 = arith.constant 0 : index
    %c0_12 = arith.constant 0 : index
    %18 = vector.load %arg4[%c0_11, %c0_12] : memref<8x2xf32, #tpu.memory_space<vmem>>, vector<8x2xf32>
    tpu.vector_store %arg4[%c0_11, %c0_12], %17 {strides = array<i32>} : memref<8x2xf32, #tpu.memory_space<vmem>>, vector<8x2xf32>,
    return
  }
  func.func @transform_0(%arg0: i32) -> (i32, i32) {
    %c0_i32 = arith.constant 0 : i32
    %c0_i32_0 = arith.constant 0 : i32
    return %arg0, %c0_i32 : i32, i32
  }
  func.func @transform_1(%arg0: i32) -> (i32, i32) {
    %c0_i32 = arith.constant 0 : i32
    %c0_i32_0 = arith.constant 0 : i32
    return %arg0, %c0_i32 : i32, i32
  }
  func.func @transform_2(%arg0: i32) -> (i32, i32, i32) {
    %c0_i32 = arith.constant 0 : i32
    %c0_i32_0 = arith.constant 0 : i32
    %c0_i32_1 = arith.constant 0 : i32
    %c0_i32_2 = arith.constant 0 : i32
    return %c0_i32, %c0_i32_0, %c0_i32_1 : i32, i32, i32
  }
  func.func @transform_3(%arg0: i32) -> (i32, i32) {
    %c0_i32 = arith.constant 0 : i32
    %c0_i32_0 = arith.constant 0 : i32
    return %arg0, %c0_i32 : i32, i32
  }
}

</mosaic_0001>

<bundles_post_ra>
// kernel: tpu_custom_call.1
= control target key start
LH: loop header
LB: loop body
LE: loop exit
PB: predicated region body
PF: predicated region fallthrough
CT: control target
= control target key end

     0   :  { %vm25_vm0 = vcmask 261120   ;;  %vm72_vm1 = vcmask 15360   ;;  %s168_s2 = inlined_call_operand.vmem [shape: f32[2,32,2], index: 2, kind: input, shape index: {}]   ;;  %s169_s1 = inlined_call_operand.vmem [shape: f32[8,32], index: 1, kind: input, shape index: {}]   ;;  %s170_s0 = inlined_call_operand.vmem [shape: f32[8,32], index: 0, kind: input, shape index: {}]   ;;  %s171_s3 = inlined_call_operand.vmem [shape: f32[8,2], index: 3, kind: output, shape index: {}]  }
   0x1   :  { %v105_v0 = vld [vmem:[%s168_s2 + $0x38] sm:$0xff]  ;;  %v104_v2 = vld [vmem:[%s168_s2 + $0x30] sm:$0xff]  ;;  %v103_v4 = vld [vmem:[%s168_s2 + $0x28] sm:$0xff] }
   0x2   :  { %v18_v1 = vld [vmem:[%s168_s2 + $0x18] sm:$0xff]  ;;  %41 = vmatpush.msra.mxu0 %v105_v0  ;;  %v17_v3 = vld [vmem:[%s168_s2 + $0x10] sm:$0xff]  ;;  %v16_v5 = vld [vmem:[%s168_s2 + $0x8] sm:$0xff] }
   0x3   :  { %64 = vmatpush.msra.mxu1 %v18_v1  ;;  %v102_v6 = vld [vmem:[%s168_s2 + $0x20] sm:$0xff] }
   0x4   :  { %42 = vmatpush.msra.mxu0 %v104_v2  ;;  %v15_v7 = vld [vmem:[%s168_s2] sm:$0xff] }
   0x5   :  { %65 = vmatpush.msra.mxu1 %v17_v3  ;;  %v19_v8 = vld [vmem:[%s169_s1] sm:$0xff] }
   0x6   :  { %43 = vmatpush.msra.mxu0 %v103_v4  ;;  %v14_v9 = vld [vmem:[%s170_s0] sm:$0xff] }
   0x7   :  { %66 = vmatpush.msra.mxu1 %v16_v5 }
   0x8   :  { %44 = vmatpush.msra.mxu0 %v102_v6 }
   0x9   :  { %67 = vmatpush.msra.mxu1 %v15_v7  ;;  %106 = vmatmul.msk.f32.vlgmr.msra.gmra.mxu0 %vm25_vm0, %v19_v8 }
   0xa   :  { %107 = vmatmul.msk.f32.vlgmr.msra.gmra.mxu1 %vm25_vm0, %v14_v9 }
  0x86   :  { %v46_v10 = vpop.f32.mrf.mxu0 }
  0x87   :  { %v69_v11 = vpop.f32.mrf.mxu1 }
  0x88   :  { %v70_v12 = vadd.f32 %v69_v11, %v46_v10 }
  0x8a   :  { %v73_v13 = vsel %vm72_vm1, %v70_v12, -inf }
  0x8b   :  { %74 = vmax.xlane.f32.xlu0 %v73_v13 }
  0xfe   :  { %v75_v14 = vpop.xlane.xlu0 %74 }
  0xff   :  { %v76_v15 = vsub.f32 %v70_v12, %v75_v14 }
 0x101   :  { %v77_v16 = vmul.f32 1.442695, %v76_v15 }
 0x103   :  { %108 = vpow2.f32 %v77_v16 }
 0x109   :  { %v109_v17 = vpop.eup %108 }
 0x10a   :  { %v79_v18 = vsel %vm72_vm1, %v109_v17, 0.0 }
 0x10b   :  { %80 = vadd.xlane.f32.xlu0 %v79_v18 }
 0x17e   :  { %v81_v19 = vpop.xlane.xlu0 %80 }
 0x17f   :  { %110 = vrcp.f32 %v81_v19  ;;  %v93_v23 = vand.u32 2147483648, %v81_v19  ;;  %v91_v25 = vand.u32 2147483647, %v81_v19  ;;  %vm87_vm3 = vweird.f32 %v81_v19 }
 0x181   :  { %v94_v27 = vor.u32 1.1754944e-38, %v93_v23  ;;  %vm92_vm5 = vcmp.eq.f32.partialorder %v91_v25, 8.507059e+37 }
 0x185   :  { %v111_v20 = vpop.eup %110 }
 0x186   :  { %v83_v21 = vmul.f32 %v111_v20, %v81_v19  ;;  %vm88_vm2 = vweird.f32 %v111_v20 }
 0x187   :  { %vm89_vm4 = vmor %vm87_vm3, %vm88_vm2 }
 0x188   :  { %v84_v22 = vsub.f32 1.0, %v83_v21 }
 0x18a   :  { %v85_v24 = vmul.f32 %v111_v20, %v84_v22 }
 0x18c   :  { %v86_v26 = vadd.f32 %v111_v20, %v85_v24 }
 0x18e   :  { %v90_v28 = vsel %vm89_vm4, %v111_v20, %v86_v26 }
 0x18f   :  { %v95_v29 = vsel %vm92_vm5, %v94_v27, %v90_v28 }
 0x190   :  { %v96_v30 = vmul.f32 %v109_v17, %v95_v29 }
 0x192   :  { %97 = vst.msk [vmem:[%s171_s3] sm:$0xff] %vm72_vm1, %v96_v30 }

</bundles_post_ra>
